<compile_context>
chip_gen: v7x
topology: tpu7x:2x2x1
jax: 0.10.0
libtpu: 0.0.40
codegen_flags: <defaults>
</compile_context>

<pallas_src>
import jax
import jax.numpy as jnp
from jax.experimental import pallas as pl
from jax.experimental.pallas import tpu as pltpu


def _round_up(x, m):
    return (x + m - 1) // m * m


def _choose_tiling(n, batch, tile_n):
    """Pick the lane-tile width.  Returns (tn, n_pad).

    Prefers a tn (multiple of 128, <= tile_n) that divides n exactly so no
    padding / post-kernel slice is needed, while keeping at least ~4 total grid
    steps so the 'parallel' axes can shard across v7x's two TensorCores.
    Falls back to padding for small / odd n.
    """
    tile_n = max(128, (tile_n // 128) * 128)
    if n % 128 == 0:
        min_tiles = -(-4 // max(batch, 1))                    # ceil(4 / batch)
        cap = min(tile_n, max(128, (n // min_tiles) // 128 * 128))
        t = cap
        while t > 128:
            if n % t == 0:
                return t, n
            t -= 128
        return 128, n
    tn = min(_round_up(n, 128), tile_n)
    return tn, _round_up(n, tn)


def _focus_kernel(x_ref, w_ref, shift_ref, o_ref):
    # x_ref:     (4C, TN)   one lane tile of the space-to-depth slab (one batch)
    # w_ref:     (c2, 4C)   1x1 conv weight with BN scale folded in (resident)
    # shift_ref: (c2, 1)    folded BatchNorm shift, f32 (resident)
    # o_ref:     (c2, TN)   lane-dense output tile
    acc = jnp.dot(w_ref[...], x_ref[...], preferred_element_type=jnp.float32)
    y = acc + shift_ref[...]
    # SiLU: y * sigmoid(y) == 0.5 * y * (1 + tanh(0.5 * y))  (single EUP op).
    y = 0.5 * y * (1.0 + jnp.tanh(0.5 * y))
    o_ref[...] = y.astype(o_ref.dtype)


def focus_forward(x, weight, gamma, beta, running_mean, running_var, *,
                  eps=1e-5, tile_n=16384, compute_dtype=None):
    """Focus forward (k=1, s=1, g=1, act=SiLU) with inference-mode BatchNorm.

    x:      (B, C, H, W) NCHW, H and W even
    weight: (c2, 4*C)    1x1 conv weight (PyTorch (c2, 4C, 1, 1) squeezed)
    gamma, beta, running_mean, running_var: (c2,) BatchNorm2d parameters
    returns (B, c2, H//2, W//2) in x.dtype
    """
    B, C, H, W = x.shape
    assert H % 2 == 0 and W % 2 == 0, "Focus needs even spatial dims"
    H2, W2 = H // 2, W // 2
    C4 = 4 * C
    c2 = weight.shape[0]
    assert weight.shape == (c2, C4)
    if compute_dtype is None:
        compute_dtype = x.dtype
    out_dtype = x.dtype

    # --- fold inference BatchNorm into the conv weight (scale) + a shift, in f32.
    inv_std = 1.0 / jnp.sqrt(running_var.astype(jnp.float32) + eps)
    g = gamma.astype(jnp.float32) * inv_std                              # (c2,)
    w_scaled = (weight.astype(jnp.float32) * g[:, None]).astype(compute_dtype)
    shift = (beta.astype(jnp.float32)
             - running_mean.astype(jnp.float32) * g).reshape(c2, 1)      # f32

    # --- space-to-depth, batch-major: (B, C, H, W) -> (B, 4C, H2*W2) with the
    # torch.cat channel order: row k = (2*wp + hp)*C + c  <->  x[b, c, 2h2+hp, 2w2+wp].
    x6 = x.astype(compute_dtype).reshape(B, C, H2, 2, W2, 2)   # b c h2 hp w2 wp
    xk = jnp.transpose(x6, (0, 5, 3, 1, 2, 4)).reshape(B, C4, H2 * W2)

    n = H2 * W2
    tn, n_pad = _choose_tiling(n, B, tile_n)
    if n_pad != n:
        xk = jnp.pad(xk, ((0, 0), (0, 0), (0, n_pad - n)))

    out = pl.pallas_call(
        _focus_kernel,
        out_shape=jax.ShapeDtypeStruct((B, c2, n_pad), out_dtype),
        grid_spec=pltpu.PrefetchScalarGridSpec(
            num_scalar_prefetch=0,
            grid=(B, n_pad // tn),
            in_specs=[
                pl.BlockSpec((None, C4, tn), lambda b, i: (b, 0, i)),   # streamed X
                pl.BlockSpec((c2, C4), lambda b, i: (0, 0)),            # resident W
                pl.BlockSpec((c2, 1), lambda b, i: (0, 0)),             # resident shift
            ],
            out_specs=pl.BlockSpec((None, c2, tn), lambda b, i: (b, 0, i)),
        ),
        compiler_params=pltpu.CompilerParams(
            dimension_semantics=("parallel", "parallel"),
        ),
    )(xk, w_scaled, shift)

    if n_pad != n:
        out = out[:, :, :n]
    return out.reshape(B, c2, H2, W2)


def reference(x, weight, gamma, beta, running_mean, running_var, eps=1e-5):
    xcat = jnp.concatenate(
        [x[:, :, ::2, ::2], x[:, :, 1::2, ::2],
         x[:, :, ::2, 1::2], x[:, :, 1::2, 1::2]], axis=1)    # (B, 4C, H2, W2)
    y = jnp.einsum("ok,bkhw->bohw", weight, xcat)             # 1x1 conv, no bias
    inv_std = 1.0 / jnp.sqrt(running_var + eps)
    y = (y - running_mean[None, :, None, None]) * (gamma * inv_std)[None, :, None, None] \
        + beta[None, :, None, None]
    return y * jax.nn.sigmoid(y)                              # SiLU


if __name__ == "__main__":
    key = jax.random.PRNGKey(0)
    B, C, H, W = 2, 4, 16, 16
    c2 = 8
    kx, kw, kg, kb, km, kv = jax.random.split(key, 6)

    x = jax.random.normal(kx, (B, C, H, W), dtype=jnp.float32)
    # Conv2d(4C, c2, 1, bias=False) default init: uniform in +/- 1/sqrt(fan_in).
    bound = 1.0 / jnp.sqrt(jnp.float32(4 * C))
    weight = jax.random.uniform(kw, (c2, 4 * C), jnp.float32, -bound, bound)
    # Non-trivial BatchNorm parameters / running stats.
    gamma = jax.random.uniform(kg, (c2,), jnp.float32, 0.5, 1.5)
    beta = jax.random.uniform(kb, (c2,), jnp.float32, -0.5, 0.5)
    running_mean = jax.random.uniform(km, (c2,), jnp.float32, -0.5, 0.5)
    running_var = jax.random.uniform(kv, (c2,), jnp.float32, 0.5, 1.5)

    ref = reference(x, weight, gamma, beta, running_mean, running_var)

    # f32 compute (matches PyTorch fp32 semantics).
    out = focus_forward(x, weight, gamma, beta, running_mean, running_var)
    jax.block_until_ready(out)
    assert out.shape == (B, c2, H // 2, W // 2)
    assert jnp.allclose(out, ref, atol=1e-4, rtol=1e-4), "f32 mismatch vs reference"

    # bf16 streamed operands (mem-bound fast path); accumulation/BN/SiLU stay f32.
    out_bf16 = focus_forward(x, weight, gamma, beta, running_mean, running_var,
                             compute_dtype=jnp.bfloat16)
    jax.block_until_ready(out_bf16)
    assert jnp.allclose(out_bf16, ref, atol=5e-2, rtol=5e-2), "bf16 mismatch vs reference"

    print("KERNEL_OK")
</pallas_src>

<mosaic_0001>
module attributes {stable_mosaic.version = 11 : i64} {
  func.func @_focus_kernel(%arg0: i32, %arg1: i32, %arg2: memref<1x16x128xf32, #tpu.memory_space<vmem>>, %arg3: memref<8x16xf32, #tpu.memory_space<vmem>>, %arg4: memref<8x1xf32, #tpu.memory_space<vmem>>, %arg5: memref<1x8x128xf32, #tpu.memory_space<vmem>>) attributes {dimension_semantics = [#tpu.dimension_semantics<parallel>, #tpu.dimension_semantics<parallel>], iteration_bounds = array<i64: 2, 1>, scalar_prefetch = 0 : i64, scratch_operands = 0 : i64, tpu.core_type = #tpu.core_type<tc>, window_params = [{transform_indices = @transform_0, window_bounds = array<i64: 1, 16, 128>}, {pipeline_mode = #tpu.pipeline_mode<synchronous>, transform_indices = @transform_1, window_bounds = array<i64: 8, 16>}, {pipeline_mode = #tpu.pipeline_mode<synchronous>, transform_indices = @transform_2, window_bounds = array<i64: 8, 1>}, {transform_indices = @transform_3, window_bounds = array<i64: 1, 8, 128>}]} {
    %c0 = arith.constant 0 : index
    %c0_0 = arith.constant 0 : index
    %0 = vector.load %arg3[%c0, %c0_0] : memref<8x16xf32, #tpu.memory_space<vmem>>, vector<8x16xf32>
    %c0_1 = arith.constant 0 : index
    %c0_2 = arith.constant 0 : index
    %c0_3 = arith.constant 0 : index
    %1 = vector.load %arg2[%c0_1, %c0_2, %c0_3] : memref<1x16x128xf32, #tpu.memory_space<vmem>>, vector<1x16x128xf32>
    %2 = vector.shape_cast %1 : vector<1x16x128xf32> to vector<16x128xf32>
    %cst = arith.constant dense<0.000000e+00> : vector<8x128xf32>
    %3 = tpu.matmul %0, %2, %cst {dimension_numbers = #tpu.dot_dimension_numbers<[1], [0], [0], [1], [0, 0, 1, 1], [], []>} : vector<8x16xf32>, vector<16x128xf32>, vector<8x128xf32> -> vector<8x128xf32>
    %c0_4 = arith.constant 0 : index
    %c0_5 = arith.constant 0 : index
    %4 = vector.load %arg4[%c0_4, %c0_5] : memref<8x1xf32, #tpu.memory_space<vmem>>, vector<8x1xf32>
    %5 = vector.broadcast %4 : vector<8x1xf32> to vector<8x128xf32>
    %6 = arith.addf %3, %5 : vector<8x128xf32>
    %cst_6 = arith.constant 5.000000e-01 : f32
    %7 = vector.broadcast %cst_6 : f32 to vector<8x128xf32>
    %8 = arith.mulf %7, %6 : vector<8x128xf32>
    %cst_7 = arith.constant 5.000000e-01 : f32
    %9 = vector.broadcast %cst_7 : f32 to vector<8x128xf32>
    %10 = arith.mulf %9, %6 : vector<8x128xf32>
    %11 = math.tanh %10 : vector<8x128xf32>
    %cst_8 = arith.constant 1.000000e+00 : f32
    %12 = vector.broadcast %cst_8 : f32 to vector<8x128xf32>
    %13 = arith.addf %12, %11 : vector<8x128xf32>
    %14 = arith.mulf %8, %13 : vector<8x128xf32>
    %c0_9 = arith.constant 0 : index
    %c0_10 = arith.constant 0 : index
    %c0_11 = arith.constant 0 : index
    %15 = vector.load %arg5[%c0_9, %c0_10, %c0_11] : memref<1x8x128xf32, #tpu.memory_space<vmem>>, vector<1x8x128xf32>
    %16 = vector.shape_cast %15 : vector<1x8x128xf32> to vector<8x128xf32>
    %17 = vector.shape_cast %14 : vector<8x128xf32> to vector<1x8x128xf32>
    tpu.vector_store %arg5[%c0_9, %c0_10, %c0_11], %17 {strides = array<i32>} : memref<1x8x128xf32, #tpu.memory_space<vmem>>, vector<1x8x128xf32>,
    return
  }
  func.func @transform_0(%arg0: i32, %arg1: i32) -> (i32, i32, i32) {
    %c0_i32 = arith.constant 0 : i32
    %c0_i32_0 = arith.constant 0 : i32
    return %arg0, %c0_i32, %arg1 : i32, i32, i32
  }
  func.func @transform_1(%arg0: i32, %arg1: i32) -> (i32, i32) {
    %c0_i32 = arith.constant 0 : i32
    %c0_i32_0 = arith.constant 0 : i32
    %c0_i32_1 = arith.constant 0 : i32
    return %c0_i32, %c0_i32_0 : i32, i32
  }
  func.func @transform_2(%arg0: i32, %arg1: i32) -> (i32, i32) {
    %c0_i32 = arith.constant 0 : i32
    %c0_i32_0 = arith.constant 0 : i32
    %c0_i32_1 = arith.constant 0 : i32
    return %c0_i32, %c0_i32_0 : i32, i32
  }
  func.func @transform_3(%arg0: i32, %arg1: i32) -> (i32, i32, i32) {
    %c0_i32 = arith.constant 0 : i32
    %c0_i32_0 = arith.constant 0 : i32
    return %arg0, %c0_i32, %arg1 : i32, i32, i32
  }
}

</mosaic_0001>

<bundles_post_ra>
// kernel: tpu_custom_call.1
= control target key start
LH: loop header
LB: loop body
LE: loop exit
PB: predicated region body
PF: predicated region fallthrough
CT: control target
= control target key end

     0   :  { %8 = vsyncpa [#allocation3], 0  ;;  %s812_s0 = inlined_call_operand.hbm [shape: f32[2,16,128], index: 0, kind: input, shape index: {}]   ;;  %s813_s1 = inlined_call_operand.vmem [shape: f32[8,16], index: 1, kind: input, shape index: {}]   ;;  %s814_s2 = inlined_call_operand.vmem [shape: f32[8,1], index: 2, kind: input, shape index: {}]   ;;  %s815_s3 = inlined_call_operand.hbm [shape: f32[2,8,128], index: 3, kind: output, shape index: {}]  }
   0x1   :  { %10 = vsyncpa [#allocation3 + $0x1], 0 }
   0x2   :  { %11 = vsyncpa [#allocation4], 0 }
   0x3   :  { %13 = vsyncpa [#allocation4 + $0x1], 0  ;;  %s632_s12 = smov 0   ;;  %s634_s13 = smov 0  }
   0x4   :  { %s636_s14 = smov 0   ;;  %s638_s15 = smov 0  }
   0x5   :  { %s640_s16 = smov 0   ;;  %s642_s17 = smov 0  }
   0x6 LB: > { %s390_s18 = sadd.s32 4294967295, %s602_s17   ;;  %s391_s19 = sadd.s32 4294967294, %s602_s17   ;;  %s602_s17 = sphi %s642_s17, %s19_s17   ;;  %s598_s16 = sphi %s640_s16, %s830_s16   ;;  %s594_s15 = sphi %s638_s15, %s829_s15   ;;  %s590_s14 = sphi %s636_s14, %s828_s14   ;;  %s586_s13 = sphi %s634_s13, %s827_s13   ;;  %s582_s12 = sphi %s632_s12, %s826_s12  }
   0x7   : > { %s31_s20 = sadd.s32 1, %s598_s16  ;;  %s40_s21 = sadd.s32 1, %s590_s14 }
   0x8   : > { %p33_p0 = scmp.ge.s32.totalorder %s31_s20, 2  ;;  %p47_p1 = scmp.ne.s32.totalorder %s590_s14, %s586_s13 }
   0x9   : > { %p48_p2 = scmp.eq.s32.totalorder %s602_s17, 0  ;;  %p53_p3 = scmp.ne.s32.totalorder %s586_s13, %s582_s12 }
   0xa   : > { %s832_s20 = smov (%p33_p0, %s31_s20), 0  ;;  %p54_p5 = scmp.eq.s32.totalorder %s390_s18, 0 }
   0xb   : > { %p673_p4 = por %p48_p2, %p47_p1  ;;  %s35_s23 = ssub.s32 %s598_s16, %s832_s20 }
   0xc   : > { %p121_p6 = scmp.eq.s32.totalorder %s390_s18, 1  ;;  %p38_p7 = scmp.eq.s32.totalorder %s35_s23, 0 }
   0xd   : > { %p679_p8 = por %p54_p5, %p53_p3  ;;  %p127_p10 = scmp.eq.s32.totalorder %s391_s19, 1 }
   0xe   : > { %p683_p9 = por %p121_p6, %p47_p1  ;;  %p431_p13 = scmp.lt.s32.totalorder %s602_s17, 2 }
   0xf   : > { %s688_s26 = scalar_select %p38_p7, %s590_s14, %s40_s21  }
  0x10   : > { %s819_s25 = scalar_select %p683_p9, 1, 0 }
  0x11   : > { %p690_p11 = por %p127_p10, %p53_p3  ;;  %s153_s28 = sand.u32 1, %s590_s14  }
  0x12   : > { %s394_s29 = sshll.u32 %s153_s28, 4  ;;  %s405_s30 = sshll.u32 %s598_s16, 8 }
  0x13   : > { %s820_s27 = scalar_select %p690_p11, 1, 0 }
  0x14   : > { %s701_s6 = scalar_lea.hbm %s812_s0, %s405_s30  ;;  %s157_s7 = scalar_lea.vmem [#allocation2], %s394_s29 }
  0x15   : > { %s165_s8 = sshll.u32 %s157_s7, 4  ;;  %p707_p0 = pnand %p431_p13, %p673_p4  ;;  %s703_s8 = int_to_ptr.vmem [resolvable:$true] %s165_s8 }
  0x16   : > { %s712_s10 = scalar_lea.sflag [#allocation3], %s153_s28  ;;  %s490_s11 = scalar_lea.hbm %s701_s6, 256 }
  0x17   : > { %p491_p2 = scmp.ne.s32.totalorder %s701_s6, %s490_s11  ;;  %p492_p3 = pneg %p707_p0 }
  0x18   : > { %s495_s21 = scalar_lea.hbm %s812_s0, 512  ;;  %p496_p4 = scmp.lt.u32.totalorder %s701_s6, %s812_s0 }
  0x19   : > { %p493_p5 = pnand %p492_p3, %p491_p2  ;;  %p497_p7 = scmp.lt.u32.totalorder %s495_s21, %s490_s11 }
  0x1a   : > { %p499_p13 = scmp.lt.u32.totalorder %s490_s11, %s701_s6 }
  0x1b   : > { %p494_p6 = pneg %p493_p5  ;;  %p498_p10 = por %p497_p7, %p496_p4 }
  0x1d   : > { %p500_p12 = por %p499_p13, %p498_p10 }
  0x1f   : > { %p501_p1 = pnand %p500_p12, %p494_p6 }
  0x21   : > { %504 = shalt.err (!%p501_p1)
}
  0x22   : > { %s505_s28 = scalar_lea.vmem %s703_s8, 256  ;;  %s604_s29 = smov [#allocation2]  }
  0x23   : > { %p506_p2 = scmp.ne.s32.totalorder %s703_s8, %s505_s28  ;;  %s510_s30 = sshll.u32 %s604_s29, 4  ;;  %s511_s30 = int_to_ptr.vmem [resolvable:$false] %s510_s30 }
  0x24   : > { %s512_s4 = scalar_lea.vmem %s511_s30, 512  ;;  %p513_p9 = scmp.lt.s32.totalorder %s703_s8, %s511_s30 }
  0x25   : > { %p508_p5 = pnand %p506_p2, %p492_p3  ;;  %p514_p4 = scmp.lt.s32.totalorder %s512_s4, %s505_s28 }
  0x27   : > { %p509_p11 = pneg %p508_p5  ;;  %p515_p7 = por %p514_p4, %p513_p9 }
  0x29   : > { %p516_p10 = pnand %p515_p7, %p509_p11 }
  0x2b   : > { %519 = shalt.err (!%p516_p10)
}
  0x2c   : > { %s605_s5 = smov 128   ;;  %s606_s7 = smov 8  }
  0x2d   : > { %426 = dma.hbm_to_vmem [thread:$0]  (!%p707_p0), %s701_s6, 256, %s703_s8, %s712_s10, %s605_s5, %s605_s5, %s606_s7  }
  0x2e   : > { %p173_p12 = scmp.lt.s32.totalorder %s602_s17, 3  ;;  %p822_p1 = scmp.ge.s32.totalorder %s602_s17, 1 }
  0x30   : > { %p174_p3 = pnand %p822_p1, %p173_p12 }
  0x31   : > { %s744_s11 = sand.u32 (!%p174_p3), 1, %s586_s13  }
  0x32   : > { %177 = sbr.rel (%p174_p3) target bundleno = 310 (0x136), region = 32  ;;  %s398_s18 = sshll.u32 (!%p174_p3), %s744_s11, 4 }
  0x33   : > { %s180_s19 = scalar_lea.sflag (!%p174_p3), [#allocation3], %s744_s11  ;;  %s183_s21 = scalar_lea.vmem (!%p174_p3), [#allocation2], %s398_s18 }
  0x39   : > { %573 = dma.done.wait (%p679_p8), %s180_s19, 256  }
  0x3a   : > { %575 = vsyncadd (%p679_p8), %s180_s19, 4294967040  ;;  %v607_v0 = vmov 0.0|0.0   ;;  %vm608_vm0 = vmmov 0   ;;  %v609_v1 = vmov 0.0   ;;  %v610_v2 = vmov 0   ;;  %v207_v3 = vld [vmem:[%s183_s21] sm:$0xff] }
  0x3b   : > { %416 = vmatprep.subr.bf16.mxu0 %v607_v0  ;;  %413 = vmatprep.mubr.msk.f32.mxu0 %vm608_vm0, %v609_v1  ;;  %v208_v4 = vld [vmem:[%s183_s21 + $0x8] sm:$0xff]  ;;  %v209_v6 = vld [vmem:[%s814_s2] sm:$0xff]  ;;  %vm215_vm1 = vcmask 130048   ;;  %s399_s10 = sshll.u32 %s744_s11, 3  ;;  %s402_s22 = sshll.u32 %s594_s15, 7 }
  0x3c   : > { %487 = vset.pattern.permute.xlu0 %v610_v2  ;;  %v417_v5 = vpack.c.bf16 %v208_v4, %v207_v3  ;;  %v206_v7 = vld [vmem:[%s813_s1] sm:$0xff]  ;;  %s205_s23 = scalar_lea.vmem [#allocation5], %s399_s10  ;;  %s763_s4 = scalar_lea.hbm %s815_s3, %s402_s22 }
  0x3d   : > { %212 = vperm.xlu0 %487, %v209_v6   ;;  %s309_s28 = sshll.u32 %s205_s23, 4  ;;  %s295_s5 = scalar_lea.sflag [#allocation4], %s744_s11  ;;  %s765_s28 = int_to_ptr.vmem [resolvable:$true] %s309_s28 }
  0x3e   : > { %418 = vmatpush3.bf16.msra.mxu0 %v417_v5  ;;  %s520_s7 = scalar_lea.vmem %s765_s28, 128  ;;  %p823_p9 = scmp.ne.s32.totalorder %s819_s25, 0 }
  0x3f   : > { %p521_p8 = scmp.ne.s32.totalorder %s765_s28, %s520_s7  ;;  %s611_s15 = smov [#allocation5]  }
  0x40   : > { %s524_s18 = sshll.u32 %s611_s15, 4  ;;  %s525_s18 = int_to_ptr.vmem [resolvable:$false] %s524_s18 }
  0x41   : > { %414 = vmatmul.mubr.msk.f32.vlgmr.msra.gmra.mrb[0].mxu0 %vm215_vm1, %v206_v7  ;;  %p522_p11 = pnand %p521_p8, %p823_p9  ;;  %s526_s19 = scalar_lea.vmem %s525_s18, 256 }
  0x42   : > { %p527_p6 = scmp.lt.s32.totalorder %s765_s28, %s525_s18  ;;  %p528_p13 = scmp.lt.s32.totalorder %s526_s19, %s520_s7 }
  0x43   : > { %p523_p0 = pneg %p522_p11 }
  0x44   : > { %p529_p2 = por %p528_p13, %p527_p6 }
  0x46   : > { %p530_p5 = pnand %p529_p2, %p523_p0 }
  0xbc   : > { %v213_v8 = vpop.permute.xlu0 %212 }
 0x114   : > { %v285_v9 = vpop.f32.mrb[0].mxu0 }
 0x115   : > { %v286_v10 = vadd.f32 %v285_v9, %v213_v8  ;;  %v415_v11 = vpop.f32.mrb[1].mxu0 }
 0x117   : > { %v289_v12 = vmul.f32 0.5, %v286_v10 }
 0x119   : > { %488 = vtanh.f32 %v289_v12 }
 0x123   : > { %v489_v13 = vpop.eup %488 }
 0x124   : > { %v291_v14 = vadd.f32 1.0, %v489_v13 }
 0x126   : > { %v292_v15 = vmul.f32 %v291_v14, %v289_v12 }
 0x128   : > { %293 = vst [vmem:[%s205_s23] sm:$0xff] %v292_v15 }
 0x129   : > { %533 = shalt.err (!%p530_p5)
}
 0x12a   : > { %s534_s11 = scalar_lea.hbm %s763_s4, 128  ;;  %s538_s8 = scalar_lea.hbm %s815_s3, 256 }
 0x12b   : > { %p535_p4 = scmp.ne.s32.totalorder %s763_s4, %s534_s11  ;;  %p539_p12 = scmp.lt.u32.totalorder %s763_s4, %s815_s3 }
 0x12c   : > { %p540_p1 = scmp.lt.u32.totalorder %s538_s8, %s534_s11  ;;  %p542_p8 = scmp.lt.u32.totalorder %s534_s11, %s763_s4 }
 0x12d   : > { %p536_p7 = pnand %p535_p4, %p823_p9 }
 0x12e   : > { %p541_p3 = por %p540_p1, %p539_p12 }
 0x12f   : > { %p537_p10 = pneg %p536_p7 }
 0x130   : > { %p543_p11 = por %p542_p8, %p541_p3 }
 0x132   : > { %p544_p0 = pnand %p543_p11, %p537_p10 }
 0x134   : > { %547 = shalt.err (!%p544_p0)
}
 0x135   : > { %421 = dma.vmem_to_hbm [thread:$0]  (%p823_p9), %s765_s28, 128, %s763_s4, %s295_s5  }
 0x136 PF: > { %s321_s10 = sand.u32 1, %s582_s12   ;;  %p824_p6 = scmp.ne.s32.totalorder %s820_s27, 0 }
 0x137   : > { %p825_p13 = scmp.ge.s32.totalorder %s602_s17, 2  ;;  %s322_s22 = scalar_lea.sflag [#allocation4], %s321_s10 }
 0x139   : > { %p428_p2 = pnand %p825_p13, %p824_p6 }
 0x13b   : > { %577 = dma.done.wait (!%p428_p2), %s322_s22, 128  }
 0x13c   : > { %579 = vsyncadd (!%p428_p2), %s322_s22, 4294967168  ;;  %s19_s17 = sadd.s32 1, %s602_s17   ;;  %s826_s12 = smov %s586_s13 }
 0x13d   : > { %p16_p5 = scmp.ge.s32.totalorder %s19_s17, 4   ;;  %s827_s13 = smov %s590_s14 }
 0x13e   : > { %s828_s14 = smov %s688_s26  ;;  %s829_s15 = smov %s598_s16 }
 0x13f   : > { %s830_s16 = smov %s832_s20  ;;  %18 = sbr.rel (!%p16_p5) target bundleno = 6 (0x6), region = 77 }
 0x146   :  { %327 = vsyncpa [#allocation3], 1 }
 0x147   :  { %329 = vsyncpa [#allocation3 + $0x1], 1 }
 0x148   :  { %330 = vsyncpa [#allocation4], 1 }
 0x149   :  { %332 = vsyncpa [#allocation4 + $0x1], 1 }

</bundles_post_ra>
